<compile_context>
chip_gen: v7x
topology: tpu7x:2x2x1
jax: 0.10.0
libtpu: 0.0.40
codegen_flags: <defaults>
</compile_context>

<pallas_src>
import jax
import jax.numpy as jnp
from jax.experimental import pallas as pl
from jax.experimental.pallas import tpu as pltpu


def _hash_u32(x):
    """lowbias32: cheap, well-mixed 32-bit integer hash (pure VPU int ops)."""
    x = x ^ (x >> 16)
    x = x * jnp.uint32(0x7FEB352D)
    x = x ^ (x >> 15)
    x = x * jnp.uint32(0x846CA68B)
    x = x ^ (x >> 16)
    return x


def make_policy_kernel(num_linear, p_drop, training):
    """Builds the fused MLP kernel.

    Kernel signature:
      kernel(seed_ref, x_ref, w1_ref, b1_ref, ..., wN_ref, bN_ref, o_ref)
    """
    apply_dropout = bool(training) and p_drop > 0.0
    # keep probability = 1 - p: keep iff uniform-uint32 bits >= p * 2^32.
    thresh_int = min(int(p_drop * float(1 << 32)), (1 << 32) - 1)
    inv_keep = 1.0 / (1.0 - p_drop) if p_drop < 1.0 else 0.0

    def kernel(seed_ref, x_ref, *refs):
        o_ref = refs[-1]
        wb_refs = refs[:-1]

        h = x_ref[...].astype(jnp.float32)
        for li in range(num_linear):
            w = wb_refs[2 * li][...]
            b = wb_refs[2 * li + 1][...]
            h = jnp.dot(h, w, preferred_element_type=jnp.float32) + b
            if li < num_linear - 1:
                if apply_dropout:
                    # Stateless per-element RNG: hash(global element index,
                    # seed, layer, grid step). Deterministic given `seed`;
                    # distribution matches torch.nn.Dropout(p) in train mode
                    # (RNG stream obviously differs from torch).
                    rows = jax.lax.broadcasted_iota(
                        jnp.int32, h.shape, 0).astype(jnp.uint32)
                    cols = jax.lax.broadcasted_iota(
                        jnp.int32, h.shape, 1).astype(jnp.uint32)
                    base = (
                        seed_ref[0].astype(jnp.uint32)
                        + pl.program_id(0).astype(jnp.uint32)
                        * jnp.uint32(0x9E3779B9)
                        + jnp.uint32(((li + 1) * 0x85EBCA6B) & 0xFFFFFFFF)
                    )
                    idx = rows * jnp.uint32(h.shape[1]) + cols + base
                    bits = _hash_u32(idx)
                    keep = bits >= jnp.uint32(thresh_int)
                    # Inverted dropout (train-mode scaling), as in torch.
                    h = jnp.where(keep, h * jnp.float32(inv_keep), 0.0)
                h = jnp.maximum(h, 0.0)  # ReLU

        # Softmax over the last (lane) axis, max-subtracted for stability.
        m = jnp.max(h, axis=-1, keepdims=True)
        e = jnp.exp(h - m)
        denom = jnp.sum(e, axis=-1, keepdims=True)
        # NOTE: pl.reciprocal(approx=True) would move this to the EUP slot on
        # TPU, but it has no interpret-mode lowering; plain division is
        # negligible at d_out=16.
        o_ref[...] = (e / denom).astype(o_ref.dtype)

    return kernel


def policy_forward(x, params, *, seed=0, training=True, p_drop=0.6, tile_b=None):
    """params: list of (W, b) with W shape (in, out), b shape (out,)."""
    B, D0 = x.shape
    if tile_b is None:
        # Big tiles: whole batch for small B, 256-row tiles otherwise.
        tile_b = B if (B <= 256 or B % 256 != 0) else 256
    assert B % tile_b == 0, "batch must be divisible by tile_b"
    num_linear = len(params)
    d_out = params[-1][0].shape[1]

    in_specs = [
        pl.BlockSpec(memory_space=pltpu.MemorySpace.SMEM),       # seed scalar
        pl.BlockSpec((tile_b, D0), lambda i: (i, 0)),             # x tile
    ]
    inputs = [jnp.asarray([seed], dtype=jnp.int32), x.astype(jnp.float32)]
    for (W, b) in params:
        din, dout = W.shape
        in_specs.append(pl.BlockSpec((din, dout), lambda i: (0, 0)))  # weight
        in_specs.append(pl.BlockSpec((1, dout), lambda i: (0, 0)))    # bias
        inputs.append(W.astype(jnp.float32))
        inputs.append(b.reshape(1, dout).astype(jnp.float32))

    kernel = make_policy_kernel(num_linear, p_drop, training)

    return pl.pallas_call(
        kernel,
        out_shape=jax.ShapeDtypeStruct((B, d_out), jnp.float32),
        grid=(B // tile_b,),
        in_specs=in_specs,
        out_specs=pl.BlockSpec((tile_b, d_out), lambda i: (i, 0)),
        compiler_params=pltpu.CompilerParams(
            dimension_semantics=("parallel",)),   # batch axis is parallel
    )(*inputs)


def init_policy_params(key, layers):
    """Deterministic nn.Linear-style init: U(-1/sqrt(fan_in), 1/sqrt(fan_in))."""
    params = []
    for i in range(len(layers) - 1):
        fan_in, fan_out = layers[i], layers[i + 1]
        key, kw, kb = jax.random.split(key, 3)
        bound = 1.0 / (fan_in ** 0.5)
        W = jax.random.uniform(kw, (fan_in, fan_out), jnp.float32, -bound, bound)
        b = jax.random.uniform(kb, (fan_out,), jnp.float32, -bound, bound)
        params.append((W, b))
    return params


def ref_forward_eval(x, params):
    """Pure-JAX reference with dropout disabled (eval-mode semantics)."""
    h = x.astype(jnp.float32)
    for i, (W, b) in enumerate(params):
        h = h @ W + b
        if i < len(params) - 1:
            h = jnp.maximum(h, 0.0)
    return jax.nn.softmax(h, axis=-1)


if __name__ == "__main__":
    key = jax.random.PRNGKey(0)
    layers = [32, 64, 16]      # Policy(layers): 32 -> 64 (drop+relu) -> 16 -> softmax
    batch = 16

    kx, kp = jax.random.split(key)
    x = jax.random.normal(kx, (batch, layers[0]), jnp.float32)
    params = init_policy_params(kp, layers)

    # 1) Deterministic check against the eval-mode reference (dropout off).
    out_eval = policy_forward(x, params, training=False)
    out_eval = jax.block_until_ready(out_eval)
    ref = ref_forward_eval(x, params)
    assert out_eval.shape == (batch, layers[-1])
    assert jnp.allclose(out_eval, ref, atol=1e-5, rtol=1e-5), "mismatch vs reference"

    # 2) Train-mode pass (dropout p=0.6 active, like nn.Module default .train()).
    #    Output rows must still be valid probability distributions.
    out_train = policy_forward(x, params, seed=1234, training=True, p_drop=0.6)
    out_train = jax.block_until_ready(out_train)
    row_sums = jnp.sum(out_train, axis=-1)
    assert jnp.allclose(row_sums, jnp.ones_like(row_sums), atol=1e-5)
    assert bool(jnp.all(out_train >= 0.0))

    print("KERNEL_OK")
</pallas_src>

<mosaic_0001>
module attributes {stable_mosaic.version = 11 : i64} {
  func.func @kernel(%arg0: i32, %arg1: memref<1xi32, #tpu.memory_space<smem>>, %arg2: memref<16x32xf32, #tpu.memory_space<vmem>>, %arg3: memref<32x64xf32, #tpu.memory_space<vmem>>, %arg4: memref<1x64xf32, #tpu.memory_space<vmem>>, %arg5: memref<64x16xf32, #tpu.memory_space<vmem>>, %arg6: memref<1x16xf32, #tpu.memory_space<vmem>>, %arg7: memref<16x16xf32, #tpu.memory_space<vmem>>) attributes {dimension_semantics = [#tpu.dimension_semantics<parallel>], iteration_bounds = array<i64: 1>, scalar_prefetch = 0 : i64, scratch_operands = 0 : i64, tpu.core_type = #tpu.core_type<tc>, window_params = [{transform_indices = @transform_0, window_bounds = array<i64: 1>}, {transform_indices = @transform_1, window_bounds = array<i64: 16, 32>}, {pipeline_mode = #tpu.pipeline_mode<synchronous>, transform_indices = @transform_2, window_bounds = array<i64: 32, 64>}, {pipeline_mode = #tpu.pipeline_mode<synchronous>, transform_indices = @transform_3, window_bounds = array<i64: 1, 64>}, {pipeline_mode = #tpu.pipeline_mode<synchronous>, transform_indices = @transform_4, window_bounds = array<i64: 64, 16>}, {pipeline_mode = #tpu.pipeline_mode<synchronous>, transform_indices = @transform_5, window_bounds = array<i64: 1, 16>}, {transform_indices = @transform_6, window_bounds = array<i64: 16, 16>}]} {
    %c0 = arith.constant 0 : index
    %c0_0 = arith.constant 0 : index
    %0 = vector.load %arg2[%c0, %c0_0] : memref<16x32xf32, #tpu.memory_space<vmem>>, vector<16x32xf32>
    %c0_1 = arith.constant 0 : index
    %c0_2 = arith.constant 0 : index
    %1 = vector.load %arg3[%c0_1, %c0_2] : memref<32x64xf32, #tpu.memory_space<vmem>>, vector<32x64xf32>
    %c0_3 = arith.constant 0 : index
    %c0_4 = arith.constant 0 : index
    %2 = vector.load %arg4[%c0_3, %c0_4] : memref<1x64xf32, #tpu.memory_space<vmem>>, vector<1x64xf32>
    %cst = arith.constant dense<0.000000e+00> : vector<16x64xf32>
    %3 = tpu.matmul %0, %1, %cst {dimension_numbers = #tpu.dot_dimension_numbers<[1], [0], [0], [1], [0, 0, 1, 1], [], []>} : vector<16x32xf32>, vector<32x64xf32>, vector<16x64xf32> -> vector<16x64xf32>
    %4 = vector.broadcast %2 : vector<1x64xf32> to vector<16x64xf32>
    %5 = arith.addf %3, %4 : vector<16x64xf32>
    %cst_5 = arith.constant 0.000000e+00 : f32
    %6 = vector.broadcast %cst_5 : f32 to vector<16x64xf32>
    %7 = arith.maximumf %5, %6 : vector<16x64xf32>
    %c0_6 = arith.constant 0 : index
    %c0_7 = arith.constant 0 : index
    %8 = vector.load %arg5[%c0_6, %c0_7] : memref<64x16xf32, #tpu.memory_space<vmem>>, vector<64x16xf32>
    %c0_8 = arith.constant 0 : index
    %c0_9 = arith.constant 0 : index
    %9 = vector.load %arg6[%c0_8, %c0_9] : memref<1x16xf32, #tpu.memory_space<vmem>>, vector<1x16xf32>
    %cst_10 = arith.constant dense<0.000000e+00> : vector<16x16xf32>
    %10 = tpu.matmul %7, %8, %cst_10 {dimension_numbers = #tpu.dot_dimension_numbers<[1], [0], [0], [1], [0, 0, 1, 1], [], []>} : vector<16x64xf32>, vector<64x16xf32>, vector<16x16xf32> -> vector<16x16xf32>
    %11 = vector.broadcast %9 : vector<1x16xf32> to vector<16x16xf32>
    %12 = arith.addf %10, %11 : vector<16x16xf32>
    %cst_11 = arith.constant dense<0xFF800000> : vector<16xf32>
    %13 = vector.multi_reduction <maximumf>, %12, %cst_11 [1] : vector<16x16xf32> to vector<16xf32>
    %14 = vector.shape_cast %13 : vector<16xf32> to vector<16x1xf32>
    %15 = vector.broadcast %14 : vector<16x1xf32> to vector<16x16xf32>
    %16 = arith.subf %12, %15 : vector<16x16xf32>
    %17 = math.exp %16 : vector<16x16xf32>
    %cst_12 = arith.constant dense<0.000000e+00> : vector<16xf32>
    %18 = vector.multi_reduction <add>, %17, %cst_12 [1] : vector<16x16xf32> to vector<16xf32>
    %19 = vector.shape_cast %18 : vector<16xf32> to vector<16x1xf32>
    %20 = vector.broadcast %19 : vector<16x1xf32> to vector<16x16xf32>
    %21 = arith.divf %17, %20 : vector<16x16xf32>
    %c0_13 = arith.constant 0 : index
    %c0_14 = arith.constant 0 : index
    %22 = vector.load %arg7[%c0_13, %c0_14] : memref<16x16xf32, #tpu.memory_space<vmem>>, vector<16x16xf32>
    tpu.vector_store %arg7[%c0_13, %c0_14], %21 {strides = array<i32>} : memref<16x16xf32, #tpu.memory_space<vmem>>, vector<16x16xf32>,
    return
  }
  func.func @transform_0(%arg0: i32) -> i32 {
    %c0_i32 = arith.constant 0 : i32
    %c0_i32_0 = arith.constant 0 : i32
    return %c0_i32 : i32
  }
  func.func @transform_1(%arg0: i32) -> (i32, i32) {
    %c0_i32 = arith.constant 0 : i32
    %c0_i32_0 = arith.constant 0 : i32
    return %arg0, %c0_i32 : i32, i32
  }
  func.func @transform_2(%arg0: i32) -> (i32, i32) {
    %c0_i32 = arith.constant 0 : i32
    %c0_i32_0 = arith.constant 0 : i32
    %c0_i32_1 = arith.constant 0 : i32
    return %c0_i32, %c0_i32_0 : i32, i32
  }
  func.func @transform_3(%arg0: i32) -> (i32, i32) {
    %c0_i32 = arith.constant 0 : i32
    %c0_i32_0 = arith.constant 0 : i32
    %c0_i32_1 = arith.constant 0 : i32
    return %c0_i32, %c0_i32_0 : i32, i32
  }
  func.func @transform_4(%arg0: i32) -> (i32, i32) {
    %c0_i32 = arith.constant 0 : i32
    %c0_i32_0 = arith.constant 0 : i32
    %c0_i32_1 = arith.constant 0 : i32
    return %c0_i32, %c0_i32_0 : i32, i32
  }
  func.func @transform_5(%arg0: i32) -> (i32, i32) {
    %c0_i32 = arith.constant 0 : i32
    %c0_i32_0 = arith.constant 0 : i32
    %c0_i32_1 = arith.constant 0 : i32
    return %c0_i32, %c0_i32_0 : i32, i32
  }
  func.func @transform_6(%arg0: i32) -> (i32, i32) {
    %c0_i32 = arith.constant 0 : i32
    %c0_i32_0 = arith.constant 0 : i32
    return %arg0, %c0_i32 : i32, i32
  }
}

</mosaic_0001>

<bundles_post_ra>
// kernel: tpu_custom_call.1
= control target key start
LH: loop header
LB: loop body
LE: loop exit
PB: predicated region body
PF: predicated region fallthrough
CT: control target
= control target key end

     0   :  { %vm38_vm0 = vcmask 261120   ;;  %s477_s0 = inlined_call_operand.<no memory space> [shape: s32[1], index: 0, kind: input, shape index: {}]   ;;  %s478_s1 = inlined_call_operand.vmem [shape: f32[16,32], index: 1, kind: input, shape index: {}]   ;;  %s479_s2 = inlined_call_operand.vmem [shape: f32[32,64], index: 2, kind: input, shape index: {}]   ;;  %s480_s3 = inlined_call_operand.vmem [shape: f32[1,64], index: 3, kind: input, shape index: {}]   ;;  %s481_s4 = inlined_call_operand.vmem [shape: f32[64,16], index: 4, kind: input, shape index: {}]   ;;  %s482_s5 = inlined_call_operand.vmem [shape: f32[1,16], index: 5, kind: input, shape index: {}]   ;;  %s483_s6 = inlined_call_operand.hbm [shape: f32[16,16], index: 6, kind: output, shape index: {}]  }
   0x1   :  { %v27_v0 = vld [vmem:[%s479_s2] sm:$0xff]  ;;  %v28_v1 = vld [vmem:[%s479_s2 + $0x8] sm:$0xff]  ;;  %v29_v2 = vld [vmem:[%s479_s2 + $0x10] sm:$0xff] }
   0x2   :  { %v312_v3 = vpack.c.bf16 %v28_v1, %v27_v0  ;;  %v30_v4 = vld [vmem:[%s479_s2 + $0x18] sm:$0xff]  ;;  %v25_v5 = vld [vmem:[%s478_s1] sm:$0xff]  ;;  %v123_v8 = vld [vmem:[%s481_s4 + $0x8] sm:$0xff] }
   0x3   :  { %v316_v6 = vpack.c.bf16 %v30_v4, %v29_v2  ;;  %290 = vmatprep.mubr.msk.f32.mxu0 %vm38_vm0, %v25_v5  ;;  %v122_v7 = vld [vmem:[%s481_s4] sm:$0xff]  ;;  %v124_v9 = vld [vmem:[%s481_s4 + $0x10] sm:$0xff]  ;;  %v125_v11 = vld [vmem:[%s481_s4 + $0x18] sm:$0xff] }
   0x4   :  { %313 = vmatprep.subr.bf16.mxu0 %v312_v3  ;;  %v320_v10 = vpack.c.bf16 %v123_v8, %v122_v7  ;;  %v324_v12 = vpack.c.bf16 %v125_v11, %v124_v9  ;;  %v126_v13 = vld [vmem:[%s481_s4 + $0x20] sm:$0xff]  ;;  %v127_v14 = vld [vmem:[%s481_s4 + $0x28] sm:$0xff] }
   0x5   :  { %315 = vmatpush3.bf16.msra.mxu0 %v312_v3 }
   0x6   :  { %12 = vsyncpa [#allocation4], 0  ;;  %317 = vmatprep.subr.bf16.mxu0 %v316_v6  ;;  %321 = vmatprep.subr.bf16.mxu1 %v320_v10  ;;  %v328_v15 = vpack.c.bf16 %v127_v14, %v126_v13  ;;  %v26_v16 = vld [vmem:[%s478_s1 + $0x8] sm:$0xff]  ;;  %v128_v17 = vld [vmem:[%s481_s4 + $0x30] sm:$0xff]  ;;  %vm137_vm1 = vcmask 523264   ;;  %vm219_vm2 = vcmask 130048  }
   0x7   :  { %323 = vmatpush3.bf16.msra.mxu1 %v320_v10  ;;  %v129_v18 = vld [vmem:[%s481_s4 + $0x38] sm:$0xff]  ;;  %v260_v20 = vld [vmem:[%s480_s3] ss:$0 sm:$0xff]  ;;  %s371_s3 = smov [#allocation3]  }
   0x8   :  { %325 = vmatprep.subr.bf16.mxu1 %v324_v12  ;;  %v332_v19 = vpack.c.bf16 %v129_v18, %v128_v17  ;;  %v263_v27 = vld [vmem:[%s482_s5] ss:$0 sm:$0xff]  ;;  %s249_s4 = sshll.u32 %s371_s3, 4  ;;  %s250_s4 = int_to_ptr.vmem [resolvable:$true] %s249_s4 }
   0x9   :  { %319 = vmatpush3.bf16.msra.mxu0 %v316_v6  ;;  %s347_s5 = scalar_lea.vmem %s250_s4, 256  ;;  %p352_p1 = scmp.lt.s32.totalorder %s250_s4, %s250_s4 }
   0xa   :  { %p348_p0 = scmp.ne.s32.totalorder %s250_s4, %s347_s5  ;;  %p353_p2 = scmp.lt.s32.totalorder %s347_s5, %s347_s5 }
   0xb   :  { %327 = vmatpush3.bf16.msra.mxu1 %v324_v12 }
   0xc   :  { %291 = vmatmul.mubr.msk.f32.vlgmr.msra.gmra.mrb[0].mxu0 %vm38_vm0, %v26_v16  ;;  %329 = vmatprep.subr.bf16.mxu1 %v328_v15  ;;  %p354_p3 = por %p353_p2, %p352_p1 }
   0xe   :  { %p355_p4 = pnand %p354_p3, %p348_p0 }
   0xf   :  { %331 = vmatpush3.bf16.msra.mxu1 %v328_v15 }
  0x10   :  { %333 = vmatprep.subr.bf16.mxu1 %v332_v19 }
  0x13   :  { %335 = vmatpush3.bf16.msra.mxu1 %v332_v19 }
  0xdf   :  { %v292_v21 = vpop.f32.mrb[0].mxu0 }
  0xe0   :  { %v117_v22 = vadd.f32 %v292_v21, %v260_v20  ;;  %v111_v23 = vpop.f32.mrb[1].mxu0 }
  0xe1   :  { %v112_v24 = vadd.f32 %v260_v20, %v111_v23 }
  0xe2   :  { %v121_v26 = vmax.f32 %v117_v22, 0.0 }
  0xe3   :  { %v120_v25 = vmax.f32 %v112_v24, 0.0 }
  0xe5   :  { %309 = vmatprep.mubr.msk.f32.mxu1 %vm137_vm1, %v120_v25 }
  0xe6   :  { %310 = vmatmul.mubr.msk.f32.vlgmr.msra.gmra.mrb[0].mxu1 %vm137_vm1, %v121_v26 }
 0x1b9   :  { %v311_v28 = vpop.f32.mrb[0].mxu1 }
 0x1ba   :  { %v210_v29 = vpop.f32.mrb[1].mxu1  ;;  %v216_v31 = vadd.f32 %v311_v28, %v263_v27 }
 0x1bb   :  { %v211_v30 = vadd.f32 %v263_v27, %v210_v29 }
 0x1bc   :  { %v223_v33 = vsel %vm219_vm2, %v216_v31, -inf }
 0x1bd   :  { %v220_v32 = vsel %vm219_vm2, %v211_v30, -inf }
 0x1be   :  { %221 = vmax.xlane.f32.xlu0 %v220_v32 }
 0x1c2   :  { %224 = vmax.xlane.f32.xlu0 %v223_v33 }
 0x24b   :  { %v222_v34 = vpop.xlane.xlu0 %221 }
 0x24c   :  { %v226_v35 = vsub.f32 %v211_v30, %v222_v34 }
 0x24e   :  { %v228_v36 = vmul.f32 1.442695, %v226_v35 }
 0x24f   :  { %v225_v37 = vpop.xlane.xlu0 %224 }
 0x250   :  { %339 = vpow2.f32 %v228_v36  ;;  %v227_v38 = vsub.f32 %v216_v31, %v225_v37 }
 0x252   :  { %v230_v39 = vmul.f32 1.442695, %v227_v38 }
 0x254   :  { %341 = vpow2.f32 %v230_v39 }
 0x25a   :  { %v340_v40 = vpop.eup %339 }
 0x25b   :  { %v232_v41 = vsel %vm219_vm2, %v340_v40, 0.0 }
 0x25c   :  { %233 = vadd.xlane.f32.xlu1 %v232_v41 }
 0x25e   :  { %v342_v42 = vpop.eup %341 }
 0x25f   :  { %v235_v43 = vsel %vm219_vm2, %v342_v42, 0.0 }
 0x260   :  { %236 = vadd.xlane.f32.xlu1 %v235_v43 }
 0x2e9   :  { %v234_v44 = vpop.xlane.xlu1 %233 }
 0x2ea   :  { %343 = vrcp.f32 %v234_v44 }
 0x2ed   :  { %v237_v45 = vpop.xlane.xlu1 %236 }
 0x2ee   :  { %345 = vrcp.f32 %v237_v45 }
 0x2f4   :  { %v344_v46 = vpop.eup %343 }
 0x2f5   :  { %v239_v47 = vmul.f32 %v344_v46, %v340_v40 }
 0x2f7   :  { %242 = vst.msk [vmem:[#allocation3] sm:$0xff] %vm219_vm2, %v239_v47 }
 0x2f8   :  { %v346_v48 = vpop.eup %345 }
 0x2f9   :  { %v241_v49 = vmul.f32 %v346_v48, %v342_v42 }
 0x2fb   :  { %243 = vst.msk [vmem:[#allocation3 + $0x8] sm:$0xff] %vm219_vm2, %v241_v49 }
 0x2fc   :  { %358 = shalt.err (!%p355_p4)
}
 0x2fd   :  { %s359_s27 = scalar_lea.hbm %s483_s6, 256 }
 0x2fe   :  { %p360_p5 = scmp.ne.s32.totalorder %s483_s6, %s359_s27  ;;  %p363_p6 = scmp.lt.u32.totalorder %s359_s27, %s483_s6 }
 0x300   :  { %p365_p7 = pnand %p363_p6, %p360_p5 }
 0x302   :  { %368 = shalt.err (!%p365_p7)
}
 0x303   :  { %s372_s8 = smov 128   ;;  %s373_s9 = smov 8  }
 0x304   :  { %255 = dma.vmem_to_hbm [thread:$0]  %s250_s4, 256, %s483_s6, [#allocation4], %s372_s8, %s372_s8, %s373_s9  }
 0x305   :  { %369 = dma.done.wait [#allocation4], 256  }
 0x306   :  { %370 = vsyncadd [#allocation4], 4294967040 }
 0x307   :  { %259 = vsyncpa [#allocation4], 1 }

</bundles_post_ra>
